<compile_context>
chip_gen: v6e
topology: v6e:2x2x1
jax: 0.10.0
libtpu: 0.0.40
codegen_flags: <defaults>
</compile_context>

<pallas_src>
import functools

import jax
import jax.numpy as jnp
from jax.experimental import pallas as pl
from jax.experimental.pallas import tpu as pltpu


def _attention_kernel(w_e_ref, enc_t_ref, bias2_ref, v_ref, mask_ref,
                      out_ref, scores_ref):
    # w_e_ref   : (Dd, De) bf16  encoder half of attn.weight (untransposed slice)
    # enc_t_ref : (De, S)  bf16  encoder_outputs^T (lane-dense over src_len)
    # bias2_ref : (Dd, 1)  f32   W_h @ hidden^T + attn.bias   (hoisted, constant over S)
    # v_ref     : (1, Dd)  f32   v.weight
    # mask_ref  : (1, S)   i32   natural row layout (0 => masked)
    # out_ref   : (1, S)   f32   module output, transposed (softmax over size-1 dim)
    # scores_ref: (1, S)   f32   masked pre-softmax attention scores (free byproduct)

    # energy^T = tanh(W_e @ enc^T + bias2)   -> (Dd, S); MXU matmul, f32 accumulate.
    proj_t = jnp.dot(w_e_ref[...], enc_t_ref[...],
                     preferred_element_type=jnp.float32)
    energy_t = jnp.tanh(proj_t + bias2_ref[...])            # VPU add + EUP tanh, f32

    # attention^T = v @ energy^T             -> (1, S); MXU (replaces XLU lane reduce).
    att = jnp.dot(v_ref[...], energy_t, preferred_element_type=jnp.float32)

    # masked_fill(mask == 0, -1e10) in the natural (1, S) layout.
    att = jnp.where(mask_ref[...] == 0, jnp.float32(-1.0e10), att)
    scores_ref[...] = att

    # F.softmax(attention, dim=1) with attention of shape (S, 1): the softmax axis
    # has size 1, so the result is exactly 1.0 everywhere.  Emit the constant to
    # keep the module's semantics without the dead exp/sum/divide.
    out_ref[...] = jnp.ones_like(att)


def prepare_attention_params(attn_w, attn_b, v_w, dec_hid_dim):
    """One-time parameter prep (do NOT redo per decoder step).

    Splits the concat-Linear weight (cat order is [hidden, encoder_outputs]),
    keeps both slices untransposed, and casts the kernel's MXU operand to bf16.
    """
    w_h = attn_w[:, :dec_hid_dim].astype(jnp.float32)    # (Dd, Dd), acts on hidden
    w_e = attn_w[:, dec_hid_dim:].astype(jnp.bfloat16)   # (Dd, De), acts on encoder
    b_col = attn_b.reshape(-1, 1).astype(jnp.float32)    # (Dd, 1)
    v_row = v_w.reshape(1, -1).astype(jnp.float32)       # (1, Dd)
    return w_h, w_e, b_col, v_row


@jax.jit
def attention_forward(hidden, encoder_outputs, mask, w_h, w_e, b_col, v_row):
    """hidden (1, Dd), encoder_outputs (S, De), mask (1, S)
    -> (module output (S, 1) f32, masked scores (1, S) f32)."""
    src_len = encoder_outputs.shape[0]

    # Hoisted hidden projection: a single (Dd, 1) column, constant over src_len.
    bias2 = jnp.dot(w_h, hidden.reshape(-1, 1).astype(jnp.float32)) + b_col

    enc_t = encoder_outputs.T.astype(jnp.bfloat16)        # (De, S) lane-dense
    mask_row = mask.astype(jnp.int32)                      # (1, S), no transpose

    vmem = functools.partial(pl.BlockSpec, memory_space=pltpu.MemorySpace.VMEM)
    out_t, scores = pl.pallas_call(
        _attention_kernel,
        out_shape=(jax.ShapeDtypeStruct((1, src_len), jnp.float32),
                   jax.ShapeDtypeStruct((1, src_len), jnp.float32)),
        in_specs=[vmem() for _ in range(5)],
        out_specs=(vmem(), vmem()),
    )(w_e, enc_t, bias2, v_row, mask_row)

    # Module returns (src_len, 1); transpose the lane-dense row back in the wrapper.
    return out_t.T, scores


if __name__ == "__main__":
    enc_hid_dim, dec_hid_dim, src_len = 32, 32, 8
    max_length = 8  # stored by the torch module but unused in forward

    key = jax.random.PRNGKey(0)
    k1, k2, k3, k4, k5, k6 = jax.random.split(key, 6)

    hidden = jax.random.normal(k1, (1, dec_hid_dim), jnp.float32)
    encoder_outputs = jax.random.normal(k2, (src_len, enc_hid_dim), jnp.float32)
    mask = (jax.random.uniform(k3, (1, src_len)) > 0.3).astype(jnp.int32)

    # Deterministic parameter init (same shapes as the nn.Linear weights/bias).
    bound_attn = float(1.0 / jnp.sqrt(enc_hid_dim + dec_hid_dim))
    bound_v = float(1.0 / jnp.sqrt(dec_hid_dim))
    attn_w = jax.random.uniform(k4, (dec_hid_dim, enc_hid_dim + dec_hid_dim),
                                jnp.float32, -bound_attn, bound_attn)
    attn_b = jax.random.uniform(k5, (dec_hid_dim,), jnp.float32,
                                -bound_attn, bound_attn)
    v_w = jax.random.uniform(k6, (1, dec_hid_dim), jnp.float32, -bound_v, bound_v)

    params = prepare_attention_params(attn_w, attn_b, v_w, dec_hid_dim)
    out, scores = attention_forward(hidden, encoder_outputs, mask, *params)
    out, scores = jax.block_until_ready((out, scores))

    # Pure-JAX reference mirroring the torch forward exactly (f32 throughout).
    h_rep = jnp.broadcast_to(hidden, (src_len, dec_hid_dim))
    x = jnp.concatenate([h_rep, encoder_outputs], axis=1)
    energy = jnp.tanh(x @ attn_w.T + attn_b)
    att = energy @ v_w.T                                   # (S, 1)
    att_masked = jnp.where(mask == 0, -1.0e10, att.T)      # (1, S) masked view
    ref_out = jax.nn.softmax(att_masked.T, axis=1)         # (S, 1): identically 1.0

    assert out.shape == (src_len, 1)
    assert jnp.allclose(out, ref_out, atol=1e-6), (out, ref_out)
    # bf16 MXU operands -> loose tolerance on the pre-softmax scores byproduct.
    assert jnp.allclose(scores, att_masked, atol=2e-2, rtol=2e-2), (scores, att_masked)
    print("KERNEL_OK")
</pallas_src>

<mosaic_0001>
module attributes {stable_mosaic.version = 11 : i64} {
  func.func @_attention_kernel(%arg0: memref<32x32xbf16, #tpu.memory_space<vmem>>, %arg1: memref<32x8xbf16, #tpu.memory_space<vmem>>, %arg2: memref<32x1xf32, #tpu.memory_space<vmem>>, %arg3: memref<1x32xf32, #tpu.memory_space<vmem>>, %arg4: memref<1x8xi32, #tpu.memory_space<vmem>>, %arg5: memref<1x8xf32, #tpu.memory_space<vmem>>, %arg6: memref<1x8xf32, #tpu.memory_space<vmem>>) attributes {dimension_semantics = [], scalar_prefetch = 0 : i64, scratch_operands = 0 : i64, tpu.core_type = #tpu.core_type<tc>} {
    %c0 = arith.constant 0 : index
    %c0_0 = arith.constant 0 : index
    %0 = vector.load %arg0[%c0, %c0_0] : memref<32x32xbf16, #tpu.memory_space<vmem>>, vector<32x32xbf16>
    %c0_1 = arith.constant 0 : index
    %c0_2 = arith.constant 0 : index
    %1 = vector.load %arg1[%c0_1, %c0_2] : memref<32x8xbf16, #tpu.memory_space<vmem>>, vector<32x8xbf16>
    %cst = arith.constant dense<0.000000e+00> : vector<32x8xf32>
    %2 = tpu.matmul %0, %1, %cst {dimension_numbers = #tpu.dot_dimension_numbers<[1], [0], [0], [1], [0, 0, 1, 1], [], []>} : vector<32x32xbf16>, vector<32x8xbf16>, vector<32x8xf32> -> vector<32x8xf32>
    %c0_3 = arith.constant 0 : index
    %c0_4 = arith.constant 0 : index
    %3 = vector.load %arg2[%c0_3, %c0_4] : memref<32x1xf32, #tpu.memory_space<vmem>>, vector<32x1xf32>
    %4 = vector.broadcast %3 : vector<32x1xf32> to vector<32x8xf32>
    %5 = arith.addf %2, %4 : vector<32x8xf32>
    %6 = math.tanh %5 : vector<32x8xf32>
    %c0_5 = arith.constant 0 : index
    %c0_6 = arith.constant 0 : index
    %7 = vector.load %arg3[%c0_5, %c0_6] : memref<1x32xf32, #tpu.memory_space<vmem>>, vector<1x32xf32>
    %cst_7 = arith.constant dense<0.000000e+00> : vector<1x8xf32>
    %8 = tpu.matmul %7, %6, %cst_7 {dimension_numbers = #tpu.dot_dimension_numbers<[1], [0], [0], [1], [0, 0, 1, 1], [], []>} : vector<1x32xf32>, vector<32x8xf32>, vector<1x8xf32> -> vector<1x8xf32>
    %c0_8 = arith.constant 0 : index
    %c0_9 = arith.constant 0 : index
    %9 = vector.load %arg4[%c0_8, %c0_9] : memref<1x8xi32, #tpu.memory_space<vmem>>, vector<1x8xi32>
    %c0_i32 = arith.constant 0 : i32
    %10 = vector.broadcast %c0_i32 : i32 to vector<1x8xi32>
    %11 = arith.cmpi eq, %9, %10 : vector<1x8xi32>
    %cst_10 = arith.constant -1.000000e+10 : f32
    %12 = vector.broadcast %cst_10 : f32 to vector<1x8xf32>
    %13 = arith.select %11, %12, %8 : vector<1x8xi1>, vector<1x8xf32>
    %c0_11 = arith.constant 0 : index
    %c0_12 = arith.constant 0 : index
    %14 = vector.load %arg6[%c0_11, %c0_12] : memref<1x8xf32, #tpu.memory_space<vmem>>, vector<1x8xf32>
    tpu.vector_store %arg6[%c0_11, %c0_12], %13 {strides = array<i32>} : memref<1x8xf32, #tpu.memory_space<vmem>>, vector<1x8xf32>,
    %cst_13 = arith.constant 1.000000e+00 : f32
    %15 = vector.broadcast %cst_13 : f32 to vector<1x8xf32>
    %c0_14 = arith.constant 0 : index
    %c0_15 = arith.constant 0 : index
    %16 = vector.load %arg5[%c0_14, %c0_15] : memref<1x8xf32, #tpu.memory_space<vmem>>, vector<1x8xf32>
    tpu.vector_store %arg5[%c0_14, %c0_15], %15 {strides = array<i32>} : memref<1x8xf32, #tpu.memory_space<vmem>>, vector<1x8xf32>,
    return
  }
}

</mosaic_0001>

<bundles_post_ra>
// kernel: attention_forward.1
= control target key start
LH: loop header
LB: loop body
LE: loop exit
PB: predicated region body
PF: predicated region fallthrough
CT: control target
= control target key end

     0   :  { %12 = vsyncpa [#allocation3], 0  ;;  %vm79_vm0 = vcmask 261120   ;;  %v346_v3 = vmov 0   ;;  %s428_s0 = inlined_call_operand.vmem [shape: bf16[32,32], index: 0, kind: input, shape index: {}]   ;;  %s429_s1 = inlined_call_operand.vmem [shape: bf16[32,8], index: 1, kind: input, shape index: {}]   ;;  %s430_s2 = inlined_call_operand.vmem [shape: f32[32,1], index: 2, kind: input, shape index: {}]   ;;  %s431_s3 = inlined_call_operand.vmem [shape: f32[1,32], index: 3, kind: input, shape index: {}]   ;;  %s432_s4 = inlined_call_operand.vmem [shape: s32[1,8], index: 4, kind: input, shape index: {}]   ;;  %s433_s5 = inlined_call_operand.hbm [shape: f32[1,8], index: 5, kind: output, shape index: {0}]   ;;  %s434_s6 = inlined_call_operand.hbm [shape: f32[1,8], index: 6, kind: output, shape index: {1}]  }
   0x1   :  { %v290_v0 = vld [vmem:[%s429_s1 + $0x8] sm:$0xff]   ;;  %v291_v1 = vld [vmem:[%s429_s1] sm:$0xff]   ;;  %288 = vset.pattern.permute.xlu0 %v346_v3  ;;  %289 = vset.pattern.permute.xlu1 %v346_v3  ;;  %v36_v4 = vld [vmem:[%s430_s2 + $0x18] sm:$0xff] }
   0x2   :  { %263 = vmatprep.subr.bf16.mxu0 %v290_v0  ;;  %v292_v2 = vld [vmem:[%s428_s0] sm:$0xff]   ;;  %v34_v5 = vld [vmem:[%s430_s2 + $0x8] sm:$0xff]  ;;  %54 = vperm.xlu0 %288, %v36_v4  }
   0x3   :  { %264 = vmatpush3.bf16.msra.mxu0 %v290_v0  ;;  %267 = vmatprep.mubr.msk.bf16.mxu0 %vm79_vm0, %v292_v2 }
   0x4   :  { %265 = vmatprep.subr.bf16.mxu0 %v291_v1  ;;  %44 = vperm.xlu1 %289, %v34_v5  }
   0x5   :  { %13 = vsyncpa [#allocation5], 0  ;;  %v293_v6 = vld [vmem:[%s428_s0 + $0x8] sm:$0xff]   ;;  %v35_v7 = vld [vmem:[%s430_s2 + $0x10] sm:$0xff]  ;;  %v347_v9 = vmov 0.0   ;;  %vm348_vm1 = vmmov 0  }
   0x6   :  { %v33_v8 = vld [vmem:[%s430_s2] sm:$0xff]  ;;  %49 = vperm.xlu0 %288, %v35_v7   ;;  %271 = vmatprep.subr.mxu1 %v347_v9  ;;  %vm216_vm2 = vcmask 57344   ;;  %s349_s12 = smov [#allocation2]   ;;  %v350_v27 = vmov 1.0  }
   0x7   :  { %266 = vmatpush3.bf16.msra.mxu0 %v291_v1  ;;  %279 = vmatprep.mubr.msk.f32.mxu1 %vm348_vm1, %v347_v9  ;;  %v139_v25 = vld [vmem:[%s431_s3] sm:$0x1]  ;;  %s225_s13 = sshll.u32 %s349_s12, 4  ;;  %218 = vst.msk [vmem:[#allocation2] sm:$0x1] %vm216_vm2, %v350_v27  ;;  %s226_s13 = int_to_ptr.vmem [resolvable:$true] %s225_s13 }
   0x8   :  { %39 = vperm.xlu1 %289, %v33_v8   ;;  %s302_s14 = scalar_lea.vmem %s226_s13, 16  ;;  %s306_s15 = scalar_lea.vmem %s226_s13, 32 }
   0x9   :  { %p303_p0 = scmp.ne.s32.totalorder %s226_s13, %s302_s14  ;;  %p307_p1 = scmp.lt.s32.totalorder %s226_s13, %s226_s13 }
   0xa   :  { %268 = vmatmul.mubr.msk.bf16.vlgmr.msra.gmra.mxu0 %vm79_vm0, %v293_v6  ;;  %p308_p2 = scmp.lt.s32.totalorder %s306_s15, %s302_s14 }
   0xc   :  { %p309_p3 = por %p308_p2, %p307_p1 }
   0xe   :  { %p310_p4 = pnand %p309_p3, %p303_p0 }
  0x7d   :  { %v55_v10 = vpop.permute.xlu0 %54 }
  0x7f   :  { %v45_v11 = vpop.permute.xlu1 %44 }
  0x81   :  { %v50_v13 = vpop.permute.xlu0 %49 }
  0x83   :  { %v40_v18 = vpop.permute.xlu1 %39 }
  0xca   :  { %v269_v12 = vpop.f32.mrf.mxu0 }
  0xcb   :  { %v129_v16 = vadd.f32 %v269_v12, %v50_v13 }
  0xcc   :  { %v120_v14 = vpop.f32.mrf.mxu0 }
  0xcd   :  { %v121_v21 = vadd.f32 %v120_v14, %v40_v18 }
  0xce   :  { %v270_v15 = vpop.f32.mrf.mxu0 }
  0xcf   :  { %v132_v17 = vadd.f32 %v270_v15, %v55_v10 }
  0xd0   :  { %v123_v19 = vpop.f32.mrf.mxu0 }
  0xd1   :  { %294 = vtanh.f32 %v132_v17  ;;  %v124_v20 = vadd.f32 %v123_v19, %v45_v11 }
  0xd2   :  { %296 = vtanh.f32 %v129_v16 }
  0xd3   :  { %298 = vtanh.f32 %v124_v20 }
  0xd4   :  { %300 = vtanh.f32 %v121_v21 }
  0xde   :  { %v295_v22 = vpop.eup %294 }
  0xdf   :  { %272 = vmatpush3.msra.mxu1 %v295_v22  ;;  %v297_v23 = vpop.eup %296 }
  0xe0   :  { %273 = vmatprep.subr.mxu1 %v347_v9  ;;  %v299_v24 = vpop.eup %298 }
  0xe1   :  { %274 = vmatpush3.msra.mxu1 %v297_v23  ;;  %v301_v26 = vpop.eup %300 }
  0xe2   :  { %275 = vmatprep.subr.mxu1 %v347_v9 }
  0xe3   :  { %276 = vmatpush3.msra.mxu1 %v299_v24 }
  0xe4   :  { %277 = vmatprep.subr.mxu1 %v347_v9 }
  0xe5   :  { %278 = vmatpush3.msra.mxu1 %v301_v26 }
  0xe6   :  { %280 = vmatmul.mubr.msk.f32.vlgmr.msra.gmra.mxu1 %vm79_vm0, %v139_v25 }
  0xe7   :  { %313 = shalt.err (!%p310_p4)
}
  0xe8   :  { %228 = dma.vmem_to_hbm [thread:$0]  %s226_s13, 16, %s433_s5, [#allocation3]   ;;  %v213_v28 = vld [vmem:[%s432_s4] sm:$0x1] }
  0xe9   :  { %s351_s19 = smov [#allocation4]   ;;  %vm214_vm3 = vcmp.eq.s32.totalorder %v213_v28, 0 }
  0xea   :  { %s235_s20 = sshll.u32 %s351_s19, 4  ;;  %s236_s20 = int_to_ptr.vmem [resolvable:$true] %s235_s20 }
  0xeb   :  { %s322_s21 = scalar_lea.vmem %s236_s20, 16  ;;  %s326_s22 = scalar_lea.vmem %s236_s20, 32 }
  0xec   :  { %p323_p5 = scmp.ne.s32.totalorder %s236_s20, %s322_s21  ;;  %p327_p6 = scmp.lt.s32.totalorder %s236_s20, %s236_s20 }
  0xed   :  { %p328_p7 = scmp.lt.s32.totalorder %s326_s22, %s322_s21 }
  0xef   :  { %p329_p8 = por %p328_p7, %p327_p6 }
  0xf1   :  { %p330_p9 = pnand %p329_p8, %p323_p5 }
 0x1a6   :  { %v209_v29 = vpop.f32.mrf.mxu1 }
 0x1a7   :  { %v215_v30 = vsel %vm214_vm3, -1e+10, %v209_v29 }
 0x1a8   :  { %217 = vst.msk [vmem:[#allocation4] sm:$0x1] %vm216_vm2, %v215_v30  ;;  %v281_v31 = vpop.f32.mrf.mxu1 }
 0x1a9   :  { %333 = shalt.err (!%p330_p9)
}
 0x1aa   :  { %238 = dma.vmem_to_hbm [thread:$0]  %s236_s20, 16, %s434_s6, [#allocation5]  }
 0x1ab   :  { %342 = dma.done.wait [#allocation3], 16  }
 0x1ac   :  { %343 = vsyncadd [#allocation3], 4294967280 }
 0x1ad   :  { %344 = dma.done.wait [#allocation5], 16  }
 0x1ae   :  { %345 = vsyncadd [#allocation5], 4294967280 }
 0x1af   :  { %245 = vsyncpa [#allocation3], 1 }
 0x1b0   :  { %246 = vsyncpa [#allocation5], 1 }

</bundles_post_ra>
